<compile_context>
chip_gen: v7x
topology: tpu7x:2x2x1
jax: 0.10.0
libtpu: 0.0.40
codegen_flags: <defaults>
</compile_context>

<pallas_src>
import math
import functools

import jax
import jax.numpy as jnp
from jax.experimental import pallas as pl
from jax.experimental.pallas import tpu as pltpu


def _self_attn_kernel(x_ref, wqkv_ref, bqkv_ref, wfc_ref, bfc_ref, out_ref,
                      ctx_ref, *, bn, t, num_heads, d_k, compute_dtype):
    """One grid step: bn (batch*node) rows of full temporal self-MHA.

    x_ref:    (bn*t, D)  flattened input block.
    wqkv_ref: (D, 3D)    fused [Wq*scale | Wk | Wv], pre-transposed.
    bqkv_ref: (1, 3D)    fused bias (bq pre-scaled), f32.
    wfc_ref:  (D, D), bfc_ref: (1, D)  output projection.
    out_ref:  (bn*t, D).
    ctx_ref:  (bn*t, D)  f32 VMEM scratch for the per-head contexts.
    """
    m, d = x_ref.shape

    # ---- fused QKV projection: one (M, D) @ (D, 3D) MXU matmul -------------
    x2 = x_ref[...].astype(compute_dtype)
    qkv = jnp.dot(x2, wqkv_ref[...], preferred_element_type=jnp.float32)
    qkv = qkv + bqkv_ref[0]                   # f32; 1/sqrt(d_k) already folded

    # Splitting the major (sublane) dim back to (bn, t, .) is free.
    q = qkv[:, 0 * d:1 * d].reshape(bn, t, d)
    k = qkv[:, 1 * d:2 * d].reshape(bn, t, d)
    v = qkv[:, 2 * d:3 * d].reshape(bn, t, d)

    # ---- per-head attention via static lane slices (unrolled over heads) ---
    # (In production, keep d_k a multiple of 128 so these slices are
    # lane-aligned; heads' contexts go straight into the f32 scratch.)
    for h in range(num_heads):
        lo = h * d_k
        qh = q[:, :, lo:lo + d_k].astype(compute_dtype)
        kh = k[:, :, lo:lo + d_k].astype(compute_dtype)
        vh = v[:, :, lo:lo + d_k].astype(compute_dtype)

        s = jnp.einsum('btd,bsd->bts', qh, kh,
                       preferred_element_type=jnp.float32)   # scale pre-folded
        mx = jnp.max(s, axis=-1, keepdims=True)
        e = jnp.exp(s - mx)
        denom = jnp.sum(e, axis=-1, keepdims=True)
        p = e * pl.reciprocal(denom, approx=True)             # EUP slot

        ch = jnp.einsum('bts,bsd->btd', p.astype(compute_dtype), vh,
                        preferred_element_type=jnp.float32)
        ctx_ref[:, lo:lo + d_k] = ch.reshape(m, d_k)

    # ---- output projection: one (M, D) @ (D, D) matmul ----------------------
    out = jnp.dot(ctx_ref[...].astype(compute_dtype), wfc_ref[...],
                  preferred_element_type=jnp.float32) + bfc_ref[0]
    out_ref[...] = out.astype(out_ref.dtype)


def _vmem_capacity_bytes():
    try:
        return int(pltpu.get_tpu_info().vmem_capacity_bytes)
    except Exception:
        return 64 * 2 ** 20      # conservative: v7x per-TensorCore VMEM


def _estimate_step_vmem_bytes(bn_tile, t, d, x_bytes, cd_bytes):
    """Rough per-grid-step VMEM footprint: double-buffered in/out blocks,
    resident weights (counted double-buffered, the pipeliner default even for
    constant-index specs), the f32 context scratch and in-body temporaries
    (qkv / q / k / v / out plus per-head score tensors)."""
    m = bn_tile * t
    blocks = 2 * m * d * x_bytes + 2 * m * d * 4
    weights = 2 * ((3 * d * d + d * d) * cd_bytes + 4 * d * 4)
    scratch = m * d * 4
    temps = 10 * m * d * 4 + 3 * bn_tile * t * t * 4
    return blocks + weights + scratch + temps


def _pick_bn_tile(bn_total, t, d, *, x_bytes, cd_bytes, target_m=512,
                  vmem_budget=None):
    """Pick a divisor of bn_total so that (a) bn_tile*T rows are a multiple of
    8 (sublane-friendly block), (b) the per-step footprint fits the VMEM
    budget, (c) there are >=2 grid steps when possible (v7x dual-TC), and
    (d) the fused row count reaches target_m to amortize per-step overhead
    and fill the MXU cadence."""
    divisors = [q for q in range(1, bn_total + 1) if bn_total % q == 0]
    cands = [q for q in divisors if (q * t) % 8 == 0] or [bn_total]

    if vmem_budget is not None:
        fit = [q for q in cands
               if _estimate_step_vmem_bytes(q, t, d, x_bytes, cd_bytes)
               <= vmem_budget]
        cands = fit or cands[:1]

    multi = [q for q in cands if bn_total // q >= 2] or cands

    for q in multi:                    # smallest tile reaching target_m rows
        if q * t >= target_m:
            return q
    return multi[-1]                   # otherwise: largest affordable tile


def temporal_self_mha_4d(x, params, *, num_heads, bn_tile=None,
                         compute_dtype=jnp.bfloat16):
    """Temporal self-attention over T for x: (B, N_nodes, T, d_model), eval.

    Matmul inputs run in `compute_dtype` (bf16 default: ~2x MXU throughput and
    half the resident weight VMEM on v5e/v6e/v7x); accumulation, softmax and
    the context scratch stay f32.  Pass compute_dtype=jnp.float32 for a tight
    numerical match with the f32 reference.
    """
    B, N, T, D = x.shape
    assert D % num_heads == 0
    d_k = D // num_heads
    bn_total = B * N

    x_bytes = jnp.dtype(x.dtype).itemsize
    cd_bytes = jnp.dtype(compute_dtype).itemsize
    vmem_cap = _vmem_capacity_bytes()

    if bn_tile is None:
        bn_tile = _pick_bn_tile(bn_total, T, D, x_bytes=x_bytes,
                                cd_bytes=cd_bytes, target_m=512,
                                vmem_budget=int(0.45 * vmem_cap))
    assert bn_total % bn_tile == 0
    m_tile = bn_tile * T
    assert m_tile % 8 == 0 or m_tile == bn_total * T, (
        "bn_tile*T must be a multiple of 8 unless it spans the whole axis")

    # Flatten (B, N, T, D) -> (B*N*T, D) in the wrapper (free on a contiguous
    # array); the kernel never merges sublane-adjacent dims in-kernel.
    xf = x.reshape(bn_total * T, D)

    scale = 1.0 / math.sqrt(d_k)
    # nn.Linear weights are (out, in); transpose for y = x @ W + b.  Fuse
    # Wq|Wk|Wv into a single (D, 3D) weight and fold 1/sqrt(d_k) into the Q
    # columns / bias (one-time O(D^2) prep, so the kernel never scales scores).
    wqkv = jnp.concatenate(
        [params['wq_w'].T * scale, params['wk_w'].T, params['wv_w'].T],
        axis=1).astype(compute_dtype)                              # (D, 3D)
    bqkv = jnp.concatenate(
        [params['wq_b'] * scale, params['wk_b'], params['wv_b']]
    ).reshape(1, 3 * D).astype(jnp.float32)
    wfc = params['fc_w'].T.astype(compute_dtype)                   # (D, D)
    bfc = params['fc_b'].reshape(1, D).astype(jnp.float32)

    grid = (bn_total // bn_tile,)

    est = _estimate_step_vmem_bytes(bn_tile, T, D, x_bytes, cd_bytes)
    vmem_limit = int(min(0.9 * vmem_cap, max(2 * est, 32 * 2 ** 20)))

    kernel = functools.partial(_self_attn_kernel, bn=bn_tile, t=T,
                               num_heads=num_heads, d_k=d_k,
                               compute_dtype=compute_dtype)

    out_flat = pl.pallas_call(
        kernel,
        out_shape=jax.ShapeDtypeStruct((bn_total * T, D), x.dtype),
        grid_spec=pltpu.PrefetchScalarGridSpec(
            num_scalar_prefetch=0,
            grid=grid,
            in_specs=[
                pl.BlockSpec((m_tile, D), lambda i: (i, 0)),
                # Constant-index weight/bias blocks stay VMEM-resident across
                # the whole grid (no per-step re-DMA).
                pl.BlockSpec((D, 3 * D), lambda i: (0, 0)),
                pl.BlockSpec((1, 3 * D), lambda i: (0, 0)),
                pl.BlockSpec((D, D), lambda i: (0, 0)),
                pl.BlockSpec((1, D), lambda i: (0, 0)),
            ],
            out_specs=pl.BlockSpec((m_tile, D), lambda i: (i, 0)),
            scratch_shapes=[pltpu.VMEM((m_tile, D), jnp.float32)]),
        compiler_params=pltpu.CompilerParams(
            dimension_semantics=("parallel",),
            vmem_limit_bytes=vmem_limit),
    )(xf, wqkv, bqkv, wfc, bfc)

    return out_flat.reshape(B, N, T, D)


def _reference(x, params, *, num_heads):
    """Pure-JAX reference matching the PyTorch forward (eval, self-attn)."""
    B, N, T, D = x.shape
    d_k = D // num_heads

    def lin(a, w, b):
        return jnp.einsum('...i,oi->...o', a, w) + b

    q = lin(x, params['wq_w'], params['wq_b'])
    k = lin(x, params['wk_w'], params['wk_b'])
    v = lin(x, params['wv_w'], params['wv_b'])

    q = q.reshape(B, N, T, num_heads, d_k).transpose(0, 1, 3, 2, 4)
    k = k.reshape(B, N, T, num_heads, d_k).transpose(0, 1, 3, 2, 4)
    v = v.reshape(B, N, T, num_heads, d_k).transpose(0, 1, 3, 2, 4)

    scores = jnp.einsum('bnhqd,bnhkd->bnhqk', q, k) / math.sqrt(d_k)
    probs = jax.nn.softmax(scores, axis=-1)
    ctx = jnp.einsum('bnhqk,bnhkd->bnhqd', probs, v)
    ctx = ctx.transpose(0, 1, 3, 2, 4).reshape(B, N, T, D)
    return lin(ctx, params['fc_w'], params['fc_b'])


def _init_params(key, d_model):
    ks = jax.random.split(key, 8)
    scale = 1.0 / math.sqrt(d_model)

    def w(k):
        return jax.random.uniform(k, (d_model, d_model), jnp.float32,
                                  minval=-scale, maxval=scale)

    def b(k):
        return jax.random.uniform(k, (d_model,), jnp.float32,
                                  minval=-scale, maxval=scale)

    return {
        'wq_w': w(ks[0]), 'wq_b': b(ks[1]),
        'wk_w': w(ks[2]), 'wk_b': b(ks[3]),
        'wv_w': w(ks[4]), 'wv_b': b(ks[5]),
        'fc_w': w(ks[6]), 'fc_b': b(ks[7]),
    }


if __name__ == "__main__":
    B, N_nodes, T, d_model, num_heads = 2, 4, 8, 32, 4

    root = jax.random.PRNGKey(0)
    kp, kx = jax.random.split(root, 2)

    params = _init_params(kp, d_model)
    x = jax.random.normal(kx, (B, N_nodes, T, d_model), jnp.float32)

    ref = _reference(x, params, num_heads=num_heads)

    # f32 matmul-input path: tight check (EUP approx reciprocal in the softmax
    # contributes ~1e-3 relative error).
    out_f32 = jax.block_until_ready(
        temporal_self_mha_4d(x, params, num_heads=num_heads,
                             compute_dtype=jnp.float32))
    assert out_f32.shape == (B, N_nodes, T, d_model)
    assert jnp.allclose(out_f32, ref, atol=5e-3, rtol=5e-3), \
        "f32 path mismatch vs reference"

    # Default bf16 matmul-input path (production config): looser tolerance for
    # bf16 quantization of matmul inputs and attention probs.
    out_bf16 = jax.block_until_ready(
        temporal_self_mha_4d(x, params, num_heads=num_heads))
    assert out_bf16.shape == (B, N_nodes, T, d_model)
    assert jnp.allclose(out_bf16, ref, atol=1e-1, rtol=1e-1), \
        "bf16 path mismatch vs reference"

    print("KERNEL_OK")
</pallas_src>

<mosaic_0001>
module attributes {stable_mosaic.version = 11 : i64} {
  func.func @_self_attn_kernel(%arg0: i32, %arg1: memref<32x32xf32, #tpu.memory_space<vmem>>, %arg2: memref<32x96xf32, #tpu.memory_space<vmem>>, %arg3: memref<1x96xf32, #tpu.memory_space<vmem>>, %arg4: memref<32x32xf32, #tpu.memory_space<vmem>>, %arg5: memref<1x32xf32, #tpu.memory_space<vmem>>, %arg6: memref<32x32xf32, #tpu.memory_space<vmem>>, %arg7: memref<32x32xf32, #tpu.memory_space<vmem>>) attributes {dimension_semantics = [#tpu.dimension_semantics<parallel>], iteration_bounds = array<i64: 2>, scalar_prefetch = 0 : i64, scratch_operands = 1 : i64, tpu.core_type = #tpu.core_type<tc>, window_params = [{transform_indices = @transform_0, window_bounds = array<i64: 32, 32>}, {pipeline_mode = #tpu.pipeline_mode<synchronous>, transform_indices = @transform_1, window_bounds = array<i64: 32, 96>}, {pipeline_mode = #tpu.pipeline_mode<synchronous>, transform_indices = @transform_2, window_bounds = array<i64: 1, 96>}, {pipeline_mode = #tpu.pipeline_mode<synchronous>, transform_indices = @transform_3, window_bounds = array<i64: 32, 32>}, {pipeline_mode = #tpu.pipeline_mode<synchronous>, transform_indices = @transform_4, window_bounds = array<i64: 1, 32>}, {transform_indices = @transform_5, window_bounds = array<i64: 32, 32>}]} {
    %c0 = arith.constant 0 : index
    %c0_0 = arith.constant 0 : index
    %0 = vector.load %arg1[%c0, %c0_0] : memref<32x32xf32, #tpu.memory_space<vmem>>, vector<32x32xf32>
    %c0_1 = arith.constant 0 : index
    %c0_2 = arith.constant 0 : index
    %1 = vector.load %arg2[%c0_1, %c0_2] : memref<32x96xf32, #tpu.memory_space<vmem>>, vector<32x96xf32>
    %cst = arith.constant dense<0.000000e+00> : vector<32x96xf32>
    %2 = tpu.matmul %0, %1, %cst {dimension_numbers = #tpu.dot_dimension_numbers<[1], [0], [0], [1], [0, 0, 1, 1], [], []>} : vector<32x32xf32>, vector<32x96xf32>, vector<32x96xf32> -> vector<32x96xf32>
    %c0_3 = arith.constant 0 : index
    %c0_4 = arith.constant 0 : index
    %3 = vector.load %arg3[%c0_3, %c0_4] : memref<1x96xf32, #tpu.memory_space<vmem>>, vector<1x96xf32>
    %4 = vector.shape_cast %3 : vector<1x96xf32> to vector<96xf32>
    %5 = vector.shape_cast %4 : vector<96xf32> to vector<1x96xf32>
    %6 = vector.broadcast %5 : vector<1x96xf32> to vector<32x96xf32>
    %7 = arith.addf %2, %6 : vector<32x96xf32>
    %8 = vector.extract_strided_slice %7 {offsets = [0, 0], sizes = [32, 32], strides = [1, 1]} : vector<32x96xf32> to vector<32x32xf32>
    %9 = vector.shape_cast %8 : vector<32x32xf32> to vector<4x8x32xf32>
    %10 = vector.extract_strided_slice %7 {offsets = [0, 32], sizes = [32, 32], strides = [1, 1]} : vector<32x96xf32> to vector<32x32xf32>
    %11 = vector.shape_cast %10 : vector<32x32xf32> to vector<4x8x32xf32>
    %12 = vector.extract_strided_slice %7 {offsets = [0, 64], sizes = [32, 32], strides = [1, 1]} : vector<32x96xf32> to vector<32x32xf32>
    %13 = vector.shape_cast %12 : vector<32x32xf32> to vector<4x8x32xf32>
    %14 = vector.extract_strided_slice %9 {offsets = [0, 0, 0], sizes = [4, 8, 8], strides = [1, 1, 1]} : vector<4x8x32xf32> to vector<4x8x8xf32>
    %15 = vector.extract_strided_slice %11 {offsets = [0, 0, 0], sizes = [4, 8, 8], strides = [1, 1, 1]} : vector<4x8x32xf32> to vector<4x8x8xf32>
    %16 = vector.extract_strided_slice %13 {offsets = [0, 0, 0], sizes = [4, 8, 8], strides = [1, 1, 1]} : vector<4x8x32xf32> to vector<4x8x8xf32>
    "tpu.trace_start"() <{level = 10 : i32, message = "btd,bsd->bts"}> : () -> ()
    %cst_5 = arith.constant dense<0.000000e+00> : vector<4x8x8xf32>
    %17 = tpu.matmul %14, %15, %cst_5 {dimension_numbers = #tpu.dot_dimension_numbers<[2], [2], [1], [1], [0, 0, 0, 1, 1, 1], [0], [0]>} : vector<4x8x8xf32>, vector<4x8x8xf32>, vector<4x8x8xf32> -> vector<4x8x8xf32>
    "tpu.trace_stop"() : () -> ()
    %cst_6 = arith.constant dense<0xFF800000> : vector<4x8xf32>
    %18 = vector.multi_reduction <maximumf>, %17, %cst_6 [2] : vector<4x8x8xf32> to vector<4x8xf32>
    %19 = vector.shape_cast %18 : vector<4x8xf32> to vector<4x8x1xf32>
    %20 = vector.broadcast %19 : vector<4x8x1xf32> to vector<4x8x8xf32>
    %21 = arith.subf %17, %20 : vector<4x8x8xf32>
    %22 = math.exp %21 : vector<4x8x8xf32>
    %cst_7 = arith.constant dense<0.000000e+00> : vector<4x8xf32>
    %23 = vector.multi_reduction <add>, %22, %cst_7 [2] : vector<4x8x8xf32> to vector<4x8xf32>
    %24 = vector.shape_cast %23 : vector<4x8xf32> to vector<4x8x1xf32>
    %25 = tpu.reciprocal %24 {approx = true} : vector<4x8x1xf32> -> vector<4x8x1xf32>
    %26 = vector.broadcast %25 : vector<4x8x1xf32> to vector<4x8x8xf32>
    %27 = arith.mulf %22, %26 : vector<4x8x8xf32>
    "tpu.trace_start"() <{level = 10 : i32, message = "bts,bsd->btd"}> : () -> ()
    %cst_8 = arith.constant dense<0.000000e+00> : vector<4x8x8xf32>
    %28 = tpu.matmul %27, %16, %cst_8 {dimension_numbers = #tpu.dot_dimension_numbers<[2], [1], [1], [2], [0, 0, 0, 1, 1, 2], [0], [0]>} : vector<4x8x8xf32>, vector<4x8x8xf32>, vector<4x8x8xf32> -> vector<4x8x8xf32>
    "tpu.trace_stop"() : () -> ()
    %29 = vector.shape_cast %28 : vector<4x8x8xf32> to vector<32x8xf32>
    %c0_9 = arith.constant 0 : index
    %c0_10 = arith.constant 0 : index
    %30 = vector.load %arg7[%c0_9, %c0_10] : memref<32x32xf32, #tpu.memory_space<vmem>>, vector<32x8xf32>
    tpu.vector_store %arg7[%c0_9, %c0_10], %29 {strides = array<i32>} : memref<32x32xf32, #tpu.memory_space<vmem>>, vector<32x8xf32>,
    %31 = vector.extract_strided_slice %9 {offsets = [0, 0, 8], sizes = [4, 8, 8], strides = [1, 1, 1]} : vector<4x8x32xf32> to vector<4x8x8xf32>
    %32 = vector.extract_strided_slice %11 {offsets = [0, 0, 8], sizes = [4, 8, 8], strides = [1, 1, 1]} : vector<4x8x32xf32> to vector<4x8x8xf32>
    %33 = vector.extract_strided_slice %13 {offsets = [0, 0, 8], sizes = [4, 8, 8], strides = [1, 1, 1]} : vector<4x8x32xf32> to vector<4x8x8xf32>
    "tpu.trace_start"() <{level = 10 : i32, message = "btd,bsd->bts"}> : () -> ()
    %cst_11 = arith.constant dense<0.000000e+00> : vector<4x8x8xf32>
    %34 = tpu.matmul %31, %32, %cst_11 {dimension_numbers = #tpu.dot_dimension_numbers<[2], [2], [1], [1], [0, 0, 0, 1, 1, 1], [0], [0]>} : vector<4x8x8xf32>, vector<4x8x8xf32>, vector<4x8x8xf32> -> vector<4x8x8xf32>
    "tpu.trace_stop"() : () -> ()
    %cst_12 = arith.constant dense<0xFF800000> : vector<4x8xf32>
    %35 = vector.multi_reduction <maximumf>, %34, %cst_12 [2] : vector<4x8x8xf32> to vector<4x8xf32>
    %36 = vector.shape_cast %35 : vector<4x8xf32> to vector<4x8x1xf32>
    %37 = vector.broadcast %36 : vector<4x8x1xf32> to vector<4x8x8xf32>
    %38 = arith.subf %34, %37 : vector<4x8x8xf32>
    %39 = math.exp %38 : vector<4x8x8xf32>
    %cst_13 = arith.constant dense<0.000000e+00> : vector<4x8xf32>
    %40 = vector.multi_reduction <add>, %39, %cst_13 [2] : vector<4x8x8xf32> to vector<4x8xf32>
    %41 = vector.shape_cast %40 : vector<4x8xf32> to vector<4x8x1xf32>
    %42 = tpu.reciprocal %41 {approx = true} : vector<4x8x1xf32> -> vector<4x8x1xf32>
    %43 = vector.broadcast %42 : vector<4x8x1xf32> to vector<4x8x8xf32>
    %44 = arith.mulf %39, %43 : vector<4x8x8xf32>
    "tpu.trace_start"() <{level = 10 : i32, message = "bts,bsd->btd"}> : () -> ()
    %cst_14 = arith.constant dense<0.000000e+00> : vector<4x8x8xf32>
    %45 = tpu.matmul %44, %33, %cst_14 {dimension_numbers = #tpu.dot_dimension_numbers<[2], [1], [1], [2], [0, 0, 0, 1, 1, 2], [0], [0]>} : vector<4x8x8xf32>, vector<4x8x8xf32>, vector<4x8x8xf32> -> vector<4x8x8xf32>
    "tpu.trace_stop"() : () -> ()
    %46 = vector.shape_cast %45 : vector<4x8x8xf32> to vector<32x8xf32>
    %c0_15 = arith.constant 0 : index
    %c8 = arith.constant 8 : index
    %47 = vector.load %arg7[%c0_15, %c8] : memref<32x32xf32, #tpu.memory_space<vmem>>, vector<32x8xf32>
    tpu.vector_store %arg7[%c0_15, %c8], %46 {strides = array<i32>} : memref<32x32xf32, #tpu.memory_space<vmem>>, vector<32x8xf32>,
    %48 = vector.extract_strided_slice %9 {offsets = [0, 0, 16], sizes = [4, 8, 8], strides = [1, 1, 1]} : vector<4x8x32xf32> to vector<4x8x8xf32>
    %49 = vector.extract_strided_slice %11 {offsets = [0, 0, 16], sizes = [4, 8, 8], strides = [1, 1, 1]} : vector<4x8x32xf32> to vector<4x8x8xf32>
    %50 = vector.extract_strided_slice %13 {offsets = [0, 0, 16], sizes = [4, 8, 8], strides = [1, 1, 1]} : vector<4x8x32xf32> to vector<4x8x8xf32>
    "tpu.trace_start"() <{level = 10 : i32, message = "btd,bsd->bts"}> : () -> ()
    %cst_16 = arith.constant dense<0.000000e+00> : vector<4x8x8xf32>
    %51 = tpu.matmul %48, %49, %cst_16 {dimension_numbers = #tpu.dot_dimension_numbers<[2], [2], [1], [1], [0, 0, 0, 1, 1, 1], [0], [0]>} : vector<4x8x8xf32>, vector<4x8x8xf32>, vector<4x8x8xf32> -> vector<4x8x8xf32>
    "tpu.trace_stop"() : () -> ()
    %cst_17 = arith.constant dense<0xFF800000> : vector<4x8xf32>
    %52 = vector.multi_reduction <maximumf>, %51, %cst_17 [2] : vector<4x8x8xf32> to vector<4x8xf32>
    %53 = vector.shape_cast %52 : vector<4x8xf32> to vector<4x8x1xf32>
    %54 = vector.broadcast %53 : vector<4x8x1xf32> to vector<4x8x8xf32>
    %55 = arith.subf %51, %54 : vector<4x8x8xf32>
    %56 = math.exp %55 : vector<4x8x8xf32>
    %cst_18 = arith.constant dense<0.000000e+00> : vector<4x8xf32>
    %57 = vector.multi_reduction <add>, %56, %cst_18 [2] : vector<4x8x8xf32> to vector<4x8xf32>
    %58 = vector.shape_cast %57 : vector<4x8xf32> to vector<4x8x1xf32>
    %59 = tpu.reciprocal %58 {approx = true} : vector<4x8x1xf32> -> vector<4x8x1xf32>
    %60 = vector.broadcast %59 : vector<4x8x1xf32> to vector<4x8x8xf32>
    %61 = arith.mulf %56, %60 : vector<4x8x8xf32>
    "tpu.trace_start"() <{level = 10 : i32, message = "bts,bsd->btd"}> : () -> ()
    %cst_19 = arith.constant dense<0.000000e+00> : vector<4x8x8xf32>
    %62 = tpu.matmul %61, %50, %cst_19 {dimension_numbers = #tpu.dot_dimension_numbers<[2], [1], [1], [2], [0, 0, 0, 1, 1, 2], [0], [0]>} : vector<4x8x8xf32>, vector<4x8x8xf32>, vector<4x8x8xf32> -> vector<4x8x8xf32>
    "tpu.trace_stop"() : () -> ()
    %63 = vector.shape_cast %62 : vector<4x8x8xf32> to vector<32x8xf32>
    %c0_20 = arith.constant 0 : index
    %c16 = arith.constant 16 : index
    %64 = vector.load %arg7[%c0_20, %c16] : memref<32x32xf32, #tpu.memory_space<vmem>>, vector<32x8xf32>
    tpu.vector_store %arg7[%c0_20, %c16], %63 {strides = array<i32>} : memref<32x32xf32, #tpu.memory_space<vmem>>, vector<32x8xf32>,
    %65 = vector.extract_strided_slice %9 {offsets = [0, 0, 24], sizes = [4, 8, 8], strides = [1, 1, 1]} : vector<4x8x32xf32> to vector<4x8x8xf32>
    %66 = vector.extract_strided_slice %11 {offsets = [0, 0, 24], sizes = [4, 8, 8], strides = [1, 1, 1]} : vector<4x8x32xf32> to vector<4x8x8xf32>
    %67 = vector.extract_strided_slice %13 {offsets = [0, 0, 24], sizes = [4, 8, 8], strides = [1, 1, 1]} : vector<4x8x32xf32> to vector<4x8x8xf32>
    "tpu.trace_start"() <{level = 10 : i32, message = "btd,bsd->bts"}> : () -> ()
    %cst_21 = arith.constant dense<0.000000e+00> : vector<4x8x8xf32>
    %68 = tpu.matmul %65, %66, %cst_21 {dimension_numbers = #tpu.dot_dimension_numbers<[2], [2], [1], [1], [0, 0, 0, 1, 1, 1], [0], [0]>} : vector<4x8x8xf32>, vector<4x8x8xf32>, vector<4x8x8xf32> -> vector<4x8x8xf32>
    "tpu.trace_stop"() : () -> ()
    %cst_22 = arith.constant dense<0xFF800000> : vector<4x8xf32>
    %69 = vector.multi_reduction <maximumf>, %68, %cst_22 [2] : vector<4x8x8xf32> to vector<4x8xf32>
    %70 = vector.shape_cast %69 : vector<4x8xf32> to vector<4x8x1xf32>
    %71 = vector.broadcast %70 : vector<4x8x1xf32> to vector<4x8x8xf32>
    %72 = arith.subf %68, %71 : vector<4x8x8xf32>
    %73 = math.exp %72 : vector<4x8x8xf32>
    %cst_23 = arith.constant dense<0.000000e+00> : vector<4x8xf32>
    %74 = vector.multi_reduction <add>, %73, %cst_23 [2] : vector<4x8x8xf32> to vector<4x8xf32>
    %75 = vector.shape_cast %74 : vector<4x8xf32> to vector<4x8x1xf32>
    %76 = tpu.reciprocal %75 {approx = true} : vector<4x8x1xf32> -> vector<4x8x1xf32>
    %77 = vector.broadcast %76 : vector<4x8x1xf32> to vector<4x8x8xf32>
    %78 = arith.mulf %73, %77 : vector<4x8x8xf32>
    "tpu.trace_start"() <{level = 10 : i32, message = "bts,bsd->btd"}> : () -> ()
    %cst_24 = arith.constant dense<0.000000e+00> : vector<4x8x8xf32>
    %79 = tpu.matmul %78, %67, %cst_24 {dimension_numbers = #tpu.dot_dimension_numbers<[2], [1], [1], [2], [0, 0, 0, 1, 1, 2], [0], [0]>} : vector<4x8x8xf32>, vector<4x8x8xf32>, vector<4x8x8xf32> -> vector<4x8x8xf32>
    "tpu.trace_stop"() : () -> ()
    %80 = vector.shape_cast %79 : vector<4x8x8xf32> to vector<32x8xf32>
    %c0_25 = arith.constant 0 : index
    %c24 = arith.constant 24 : index
    %81 = vector.load %arg7[%c0_25, %c24] : memref<32x32xf32, #tpu.memory_space<vmem>>, vector<32x8xf32>
    tpu.vector_store %arg7[%c0_25, %c24], %80 {strides = array<i32>} : memref<32x32xf32, #tpu.memory_space<vmem>>, vector<32x8xf32>,
    %c0_26 = arith.constant 0 : index
    %c0_27 = arith.constant 0 : index
    %82 = vector.load %arg7[%c0_26, %c0_27] : memref<32x32xf32, #tpu.memory_space<vmem>>, vector<32x32xf32>
    %c0_28 = arith.constant 0 : index
    %c0_29 = arith.constant 0 : index
    %83 = vector.load %arg4[%c0_28, %c0_29] : memref<32x32xf32, #tpu.memory_space<vmem>>, vector<32x32xf32>
    %cst_30 = arith.constant dense<0.000000e+00> : vector<32x32xf32>
    %84 = tpu.matmul %82, %83, %cst_30 {dimension_numbers = #tpu.dot_dimension_numbers<[1], [0], [0], [1], [0, 0, 1, 1], [], []>} : vector<32x32xf32>, vector<32x32xf32>, vector<32x32xf32> -> vector<32x32xf32>
    %c0_31 = arith.constant 0 : index
    %c0_32 = arith.constant 0 : index
    %85 = vector.load %arg5[%c0_31, %c0_32] : memref<1x32xf32, #tpu.memory_space<vmem>>, vector<1x32xf32>
    %86 = vector.shape_cast %85 : vector<1x32xf32> to vector<32xf32>
    %87 = vector.shape_cast %86 : vector<32xf32> to vector<1x32xf32>
    %88 = vector.broadcast %87 : vector<1x32xf32> to vector<32x32xf32>
    %89 = arith.addf %84, %88 : vector<32x32xf32>
    %c0_33 = arith.constant 0 : index
    %c0_34 = arith.constant 0 : index
    %90 = vector.load %arg6[%c0_33, %c0_34] : memref<32x32xf32, #tpu.memory_space<vmem>>, vector<32x32xf32>
    tpu.vector_store %arg6[%c0_33, %c0_34], %89 {strides = array<i32>} : memref<32x32xf32, #tpu.memory_space<vmem>>, vector<32x32xf32>,
    return
  }
  func.func @transform_0(%arg0: i32) -> (i32, i32) {
    %c0_i32 = arith.constant 0 : i32
    %c0_i32_0 = arith.constant 0 : i32
    return %arg0, %c0_i32 : i32, i32
  }
  func.func @transform_1(%arg0: i32) -> (i32, i32) {
    %c0_i32 = arith.constant 0 : i32
    %c0_i32_0 = arith.constant 0 : i32
    %c0_i32_1 = arith.constant 0 : i32
    return %c0_i32, %c0_i32_0 : i32, i32
  }
  func.func @transform_2(%arg0: i32) -> (i32, i32) {
    %c0_i32 = arith.constant 0 : i32
    %c0_i32_0 = arith.constant 0 : i32
    %c0_i32_1 = arith.constant 0 : i32
    return %c0_i32, %c0_i32_0 : i32, i32
  }
  func.func @transform_3(%arg0: i32) -> (i32, i32) {
    %c0_i32 = arith.constant 0 : i32
    %c0_i32_0 = arith.constant 0 : i32
    %c0_i32_1 = arith.constant 0 : i32
    return %c0_i32, %c0_i32_0 : i32, i32
  }
  func.func @transform_4(%arg0: i32) -> (i32, i32) {
    %c0_i32 = arith.constant 0 : i32
    %c0_i32_0 = arith.constant 0 : i32
    %c0_i32_1 = arith.constant 0 : i32
    return %c0_i32, %c0_i32_0 : i32, i32
  }
  func.func @transform_5(%arg0: i32) -> (i32, i32) {
    %c0_i32 = arith.constant 0 : i32
    %c0_i32_0 = arith.constant 0 : i32
    return %arg0, %c0_i32 : i32, i32
  }
}

</mosaic_0001>

<bundles_post_ra>
// kernel: tpu_custom_call.1
= control target key start
LH: loop header
LB: loop body
LE: loop exit
PB: predicated region body
PF: predicated region fallthrough
CT: control target
= control target key end

     0   :  { %s3712_s18 = smov 0   ;;  %s4060_s0 = inlined_call_operand.vmem [shape: f32[64,32], index: 0, kind: input, shape index: {}]   ;;  %s4061_s1 = inlined_call_operand.vmem [shape: f32[32,96], index: 1, kind: input, shape index: {}]   ;;  %s4062_s2 = inlined_call_operand.vmem [shape: f32[1,96], index: 2, kind: input, shape index: {}]   ;;  %s4063_s3 = inlined_call_operand.vmem [shape: f32[32,32], index: 3, kind: input, shape index: {}]   ;;  %s4064_s4 = inlined_call_operand.vmem [shape: f32[1,32], index: 4, kind: input, shape index: {}]   ;;  %s4065_s5 = inlined_call_operand.vmem [shape: f32[64,32], index: 5, kind: output, shape index: {}]  }
   0x1 LB: > { %s3217_s19 = sadd.s32 4294967295, %s3664_s18   ;;  %p3221_p0 = scmp.ge.s32.totalorder %s3664_s18, 1  ;;  %s3664_s18 = sphi %s3712_s18, %s15_s18  }
   0x2   : > { %p188_p1 = scmp.lt.s32.totalorder %s3664_s18, 3 }
   0x4   : > { %p189_p2 = pnand %p3221_p0, %p188_p1 }
   0x5   : > { %v232_v0 = vld [vmem:[%s4061_s1] sm:$0xff] (!%p189_p2)  ;;  %v233_v1 = vld [vmem:[%s4061_s1 + $0x8] sm:$0xff] (!%p189_p2)  ;;  %v234_v2 = vld [vmem:[%s4061_s1 + $0x10] sm:$0xff] (!%p189_p2)  ;;  %s3222_s26 = sshll.u32 (!%p189_p2), %s3217_s19, 2  ;;  %vm243_vm0 = vcmask (!%p189_p2), 261120   ;;  %v3666_v10 = vmov (!%p189_p2), 0.0  }
   0x6   : > { %192 = sbr.rel (%p189_p2) target bundleno = 3186 (0xc72), region = 40  ;;  %v3554_v3 = vpack.c.bf16 (!%p189_p2), %v233_v1, %v232_v0  ;;  %v235_v4 = vld [vmem:[%s4061_s1 + $0x18] sm:$0xff] (!%p189_p2)  ;;  %p217_p3 = scmp.lt.s32.totalorder (!%p189_p2), %s3222_s26, 7  ;;  %3385 = vmatprep.subr.mxu1 (!%p189_p2), %v3666_v10  ;;  %vm3667_vm1 = vmmov (!%p189_p2), 0   ;;  %v3226_v11 = vld [vmem:[%s4062_s2] ss:$0 sm:$0xff] (!%p189_p2) }
   0x7   : > { %v3558_v5 = vpack.c.bf16 (!%p189_p2), %v235_v4, %v234_v2  ;;  %3387 = vmatprep.mubr.msk.f32.mxu1 (!%p189_p2), %vm3667_vm1, %v3666_v10  ;;  %s3668_s10 = smov (!%p189_p2), 96   ;;  %vm344_vm2 = vcmask (!%p189_p2), 64512   ;;  %s3669_s11 = smov (!%p189_p2), 64   ;;  %vm1678_vm3 = vcmask (!%p189_p2), 130112   ;;  %vm2359_vm4 = vcmask (!%p189_p2), 195712  }
   0x8   : > { %3555 = vmatprep.subr.bf16.mxu0 (!%p189_p2), %v3554_v3  ;;  %s3670_s12 = smov (!%p189_p2), 88   ;;  %s3671_s13 = smov (!%p189_p2), 120   ;;  %vm3040_vm5 = vcmask (!%p189_p2), 261312  }
   0x9   : > { %3557 = vmatpush3.bf16.msra.mxu0 (!%p189_p2), %v3554_v3  ;;  %s3672_s14 = smov (!%p189_p2), 56   ;;  %s3673_s15 = smov (!%p189_p2), 80  }
   0xa   : > { %3559 = vmatprep.subr.bf16.mxu0 (!%p189_p2), %v3558_v5  ;;  %s3674_s16 = smov (!%p189_p2), 112   ;;  %s3675_s17 = smov (!%p189_p2), 48  }
   0xb   : > { %s3676_s19 = smov (!%p189_p2), 72   ;;  %s3677_s20 = smov (!%p189_p2), 104  }
   0xc   : > { %s3678_s21 = smov (!%p189_p2), 40   ;;  %s3679_s22 = smov (!%p189_p2), 8  }
   0xd   : > { %s4067_s26 = smov (!%p217_p3, %s3222_s26), 7  ;;  %3561 = vmatpush3.bf16.msra.mxu0 %v3558_v5  ;;  %s3680_s23 = smov 16  }
   0xe   : > { %s3223_s29 = sshll.u32 %s4067_s26, 3  ;;  %3380 = vmatprep.subr.mxu0 %v3666_v10  ;;  %s3681_s9 = smov 24  }
   0xf   : > { %s220_s7 = scalar_lea.vmem %s4060_s0, %s3223_s29 }
  0x10   : > { %v228_v6 = vld [vmem:[%s220_s7] sm:$0xff]  ;;  %v229_v7 = vld [vmem:[%s220_s7 + $0x8] sm:$0xff]  ;;  %v230_v8 = vld [vmem:[%s220_s7 + $0x10] sm:$0xff] }
  0x11   : > { %3374 = vmatprep.mubr.msk.f32.mxu0 %vm243_vm0, %v228_v6  ;;  %v231_v9 = vld [vmem:[%s220_s7 + $0x18] sm:$0xff] }
  0x12   : > { %3375 = vmatmul.mubr.msk.f32.vlgmr.msra.gmra.mrb[0].mxu0 %vm243_vm0, %v229_v7 }
  0x13   : > { %3377 = vmatprep.mubr.msk.f32.mxu0 %vm243_vm0, %v230_v8 }
  0x16   : > { %3378 = vmatmul.mubr.msk.f32.gmra.mrb[2].mxu0 %vm243_vm0, %v231_v9 }
  0x17   : > { %3382 = vmatprep.mubr.msk.f32.mxu0 %vm3667_vm1, %v3666_v10 }
  0xe5   : > { %v3376_v12 = vpop.f32.mrb[0].mxu0 }
  0xe6   : > { %v322_v13 = vpop.f32.mrb[1].mxu0  ;;  %v3756_v17 = vadd.f32 %v3376_v12, %v3226_v11 }
  0xe7   : > { %v3753_v14 = vadd.f32 %v3226_v11, %v322_v13 }
  0xe9   : > { %v3379_v15 = vpop.f32.mrb[2].mxu0  ;;  %342 = vrot.lane.b32.xlu0 %v3753_v14, %s3668_s10 }
  0xea   : > { %v332_v16 = vpop.f32.mrb[3].mxu0  ;;  %v3760_v19 = vadd.f32 %v3379_v15, %v3226_v11 }
  0xeb   : > { %v3758_v18 = vadd.f32 %v3226_v11, %v332_v16 }
  0xed   : > { %497 = vrot.lane.b32.xlu1 %v3758_v18, %s3668_s10  ;;  %420 = vrot.lane.b32.xlu0 %v3756_v17, %s3668_s10 }
  0xf1   : > { %574 = vrot.lane.b32.xlu1 %v3760_v19, %s3668_s10 }
 0x15b   : > { %v343_v20 = vpop.permute.xlu0 %342 }
 0x15c   : > { %3381 = vmatpush3.xpose.msk.msra.mxu0 %vm344_vm2, %v343_v20 }
 0x15d   : > { %3395 = vmatprep.subr.mxu0 %v3666_v10 }
 0x15f   : > { %v498_v21 = vpop.permute.xlu1 %497  ;;  %3383 = vmatmul.mubr.msk.f32.vlgmr.msra.gmra.mrb[4].mxu0 %vm344_vm2, %v3753_v14  ;;  %v421_v22 = vpop.permute.xlu0 %420 }
 0x160   : > { %3386 = vmatpush3.xpose.msk.msra.mxu1 %vm344_vm2, %v421_v22  ;;  %3397 = vmatprep.mubr.msk.f32.mxu0 %vm3667_vm1, %v3666_v10 }
 0x161   : > { %3390 = vmatprep.subr.mxu1 %v3666_v10 }
 0x163   : > { %v575_v23 = vpop.permute.xlu1 %574  ;;  %3388 = vmatmul.mubr.msk.f32.vlgmr.msra.gmra.mrb[0].mxu1 %vm344_vm2, %v3756_v17 }
 0x164   : > { %3391 = vmatpush3.xpose.msk.msra.mxu1 %vm344_vm2, %v498_v21  ;;  %3396 = vmatpush3.xpose.msk.msra.mxu0 %vm344_vm2, %v575_v23 }
 0x165   : > { %3392 = vmatprep.mubr.msk.f32.mxu1 %vm3667_vm1, %v3666_v10  ;;  %3400 = vmatprep.subr.mxu1 %v3666_v10 }
 0x166   : > { %3405 = vmatprep.subr.mxu0 %v3666_v10 }
 0x167   : > { %3393 = vmatmul.mubr.msk.f32.vlgmr.msra.gmra.mrb[2].mxu1 %vm344_vm2, %v3758_v18  ;;  %3398 = vmatmul.mubr.msk.f32.vlgmr.msra.gmra.mrb[6].mxu0 %vm344_vm2, %v3760_v19 }
 0x168   : > { %3402 = vmatprep.mubr.msk.f32.mxu1 %vm3667_vm1, %v3666_v10  ;;  %3407 = vmatprep.mubr.msk.f32.mxu0 %vm3667_vm1, %v3666_v10 }
 0x232   : > { %v415_v24 = vpop.f32.mrb[4].mxu0 }
 0x233   : > { %v3384_v25 = vpop.f32.mrb[5].mxu0  ;;  %v650_v26 = vsel %vm344_vm2, %v415_v24, -inf }
 0x234   : > { %651 = vmax.xlane.f32.xlu0 %v650_v26 }
 0x236   : > { %v492_v27 = vpop.f32.mrb[0].mxu1 }
 0x237   : > { %v3389_v28 = vpop.f32.mrb[1].mxu1  ;;  %v653_v29 = vsel %vm344_vm2, %v492_v27, -inf }
 0x238   : > { %654 = vmax.xlane.f32.xlu1 %v653_v29 }
 0x23a   : > { %v569_v30 = vpop.f32.mrb[2].mxu1  ;;  %v646_v31 = vpop.f32.mrb[6].mxu0 }
 0x23b   : > { %v3394_v32 = vpop.f32.mrb[3].mxu1  ;;  %v3399_v33 = vpop.f32.mrb[7].mxu0  ;;  %v656_v34 = vsel %vm344_vm2, %v569_v30, -inf  ;;  %v659_v35 = vsel %vm344_vm2, %v646_v31, -inf }
 0x23c   : > { %657 = vmax.xlane.f32.xlu0 %v656_v34 }
 0x240   : > { %660 = vmax.xlane.f32.xlu0 %v659_v35 }
 0x249   : > { %694 = vrot.lane.b32.xlu1 %v3753_v14, %s3669_s11 }
 0x24d   : > { %846 = vrot.lane.b32.xlu1 %v3758_v18, %s3669_s11 }
 0x251   : > { %922 = vrot.lane.b32.xlu1 %v3760_v19, %s3669_s11 }
 0x255   : > { %1082 = vrot.lane.b32.xlu1 %v3756_v17, %s3670_s12 }
 0x256   : > { %770 = vrot.lane.b32.xlu0 %v3756_v17, %s3669_s11 }
 0x25a   : > { %1004 = vrot.lane.b32.xlu0 %v3753_v14, %s3670_s12 }
 0x2c1   : > { %v652_v36 = vpop.xlane.xlu0 %651 }
 0x2c2   : > { %v662_v37 = vsub.f32 %v415_v24, %v652_v36 }
 0x2c4   : > { %v666_v38 = vmul.f32 1.442695, %v662_v37 }
 0x2c5   : > { %v655_v39 = vpop.xlane.xlu1 %654 }
 0x2c6   : > { %3594 = vpow2.f32 %v666_v38  ;;  %v663_v40 = vsub.f32 %v492_v27, %v655_v39 }
 0x2c8   : > { %v668_v41 = vmul.f32 1.442695, %v663_v40 }
 0x2c9   : > { %v695_v42 = vpop.permute.xlu1 %694  ;;  %v658_v43 = vpop.xlane.xlu0 %657 }
 0x2ca   : > { %3596 = vpow2.f32 %v668_v41  ;;  %v664_v44 = vsub.f32 %v569_v30, %v658_v43  ;;  %3401 = vmatpush3.msra.mxu1 %v695_v42 }
 0x2cb   : > { %3410 = vmatprep.subr.mxu1 %v3666_v10 }
 0x2cc   : > { %v670_v45 = vmul.f32 1.442695, %v664_v44 }
 0x2cd   : > { %v661_v46 = vpop.xlane.xlu0 %660  ;;  %v847_v58 = vpop.permute.xlu1 %846 }
 0x2ce   : > { %3598 = vpow2.f32 %v670_v45  ;;  %v665_v47 = vsub.f32 %v646_v31, %v661_v46 }
 0x2d0   : > { %v3595_v48 = vpop.eup %3594  ;;  %v672_v49 = vmul.f32 1.442695, %v665_v47 }
 0x2d1   : > { %v771_v50 = vpop.permute.xlu0 %770  ;;  %v674_v51 = vsel %vm344_vm2, %v3595_v48, 0.0  ;;  %v923_v59 = vpop.permute.xlu1 %922 }
 0x2d2   : > { %3600 = vpow2.f32 %v672_v49  ;;  %675 = vadd.xlane.f32.xlu1 %v674_v51  ;;  %3406 = vmatpush3.msra.mxu0 %v771_v50 }
 0x2d3   : > { %3415 = vmatprep.subr.mxu0 %v3666_v10 }
 0x2d4   : > { %v3597_v52 = vpop.eup %3596 }
 0x2d5   : > { %v677_v53 = vsel %vm344_vm2, %v3597_v52, 0.0  ;;  %v1083_v60 = vpop.permute.xlu1 %1082  ;;  %v1005_v61 = vpop.permute.xlu0 %1004 }
 0x2d6   : > { %678 = vadd.xlane.f32.xlu0 %v677_v53 }
 0x2d8   : > { %v3599_v54 = vpop.eup %3598 }
 0x2d9   : > { %v680_v55 = vsel %vm344_vm2, %v3599_v54, 0.0 }
 0x2da   : > { %681 = vadd.xlane.f32.xlu1 %v680_v55 }
 0x2dc   : > { %v3601_v56 = vpop.eup %3600 }
 0x2dd   : > { %v683_v57 = vsel %vm344_vm2, %v3601_v56, 0.0 }
 0x2de   : > { %684 = vadd.xlane.f32.xlu0 %v683_v57 }
 0x2eb   : > { %1080 = vrot.lane.b32.xlu1 %v3756_v17, %s3671_s13 }
 0x2ef   : > { %1238 = vrot.lane.b32.xlu1 %v3760_v19, %s3670_s12 }
 0x2f3   : > { %1236 = vrot.lane.b32.xlu1 %v3760_v19, %s3671_s13 }
 0x2f4   : > { %1002 = vrot.lane.b32.xlu0 %v3753_v14, %s3671_s13 }
 0x2f8   : > { %1160 = vrot.lane.b32.xlu0 %v3758_v18, %s3670_s12 }
 0x2fc   : > { %1158 = vrot.lane.b32.xlu0 %v3758_v18, %s3671_s13 }
 0x35f   : > { %v676_v62 = vpop.xlane.xlu1 %675 }
 0x360   : > { %3602 = vrcp.f32 %v676_v62 }
 0x363   : > { %v679_v63 = vpop.xlane.xlu0 %678 }
 0x364   : > { %3604 = vrcp.f32 %v679_v63 }
 0x367   : > { %v682_v0 = vpop.xlane.xlu1 %681 }
 0x368   : > { %3606 = vrcp.f32 %v682_v0 }
 0x36a   : > { %v3603_v1 = vpop.eup %3602 }
 0x36b   : > { %v690_v2 = vmul.f32 %v3603_v1, %v3595_v48  ;;  %v685_v3 = vpop.xlane.xlu0 %684  ;;  %v1081_v9 = vpop.permute.xlu1 %1080 }
 0x36c   : > { %3608 = vrcp.f32 %v685_v3 }
 0x36d   : > { %3403 = vmatmul.mubr.msk.f32.vlgmr.msra.gmra.mrb[4].mxu1 %vm344_vm2, %v690_v2 }
 0x36e   : > { %v3605_v4 = vpop.eup %3604  ;;  %3411 = vmatpush3.msra.mxu1 %v847_v58  ;;  %3412 = vmatprep.mubr.msk.f32.mxu1 %vm3667_vm1, %v3666_v10 }
 0x36f   : > { %v691_v5 = vmul.f32 %v3605_v4, %v3597_v52  ;;  %3420 = vmatprep.subr.mxu1 %v3666_v10  ;;  %v1003_v6 = vpop.permute.xlu0 %1002  ;;  %v1239_v15 = vpop.permute.xlu1 %1238 }
 0x371   : > { %3408 = vmatmul.mubr.msk.f32.vlgmr.msra.gmra.mrb[8].mxu0 %vm344_vm2, %v691_v5 }
 0x372   : > { %v3607_v7 = vpop.eup %3606  ;;  %3416 = vmatpush3.msra.mxu0 %v923_v59  ;;  %3417 = vmatprep.mubr.msk.f32.mxu0 %vm3667_vm1, %v3666_v10 }
 0x373   : > { %v692_v8 = vmul.f32 %v3607_v7, %v3599_v54  ;;  %3425 = vmatprep.subr.mxu0 %v3666_v10  ;;  %v1161_v12 = vpop.permute.xlu0 %1160  ;;  %v1237_v20 = vpop.permute.xlu1 %1236 }
 0x375   : > { %3413 = vmatmul.mubr.msk.f32.vlgmr.msra.gmra.mrb[6].mxu1 %vm344_vm2, %v692_v8 }
 0x376   : > { %v3609_v11 = vpop.eup %3608  ;;  %3421 = vmatpush3.xpose.msk.msra.mxu1 %vm344_vm2, %v1005_v61  ;;  %3422 = vmatprep.mubr.msk.f32.mxu1 %vm3667_vm1, %v3666_v10 }
 0x377   : > { %v693_v13 = vmul.f32 %v3609_v11, %v3601_v56  ;;  %3430 = vmatprep.subr.mxu1 %v3666_v10  ;;  %v1159_v16 = vpop.permute.xlu0 %1158 }
 0x379   : > { %3418 = vmatmul.mubr.msk.f32.vlgmr.msra.gmra.mrb[10].mxu0 %vm344_vm2, %v693_v13  ;;  %3423 = vmatmul.mubr.msk.f32.vlgmr.msra.gmra.mrb[8].mxu1 %vm344_vm2, %v1003_v6 }
 0x37a   : > { %3426 = vmatpush3.xpose.msk.msra.mxu0 %vm344_vm2, %v1083_v60  ;;  %3431 = vmatpush3.xpose.msk.msra.mxu1 %vm344_vm2, %v1161_v12 }
 0x37b   : > { %3427 = vmatprep.mubr.msk.f32.mxu0 %vm3667_vm1, %v3666_v10  ;;  %3432 = vmatprep.mubr.msk.f32.mxu1 %vm3667_vm1, %v3666_v10 }
 0x37c   : > { %3435 = vmatprep.subr.mxu0 %v3666_v10  ;;  %3440 = vmatprep.subr.mxu1 %v3666_v10 }
 0x37d   : > { %3428 = vmatmul.mubr.msk.f32.vlgmr.msra.gmra.mrb[12].mxu0 %vm344_vm2, %v1081_v9  ;;  %3433 = vmatmul.mubr.msk.f32.vlgmr.msra.gmra.mrb[10].mxu1 %vm344_vm2, %v1159_v16 }
 0x37e   : > { %3436 = vmatpush3.xpose.msk.msra.mxu0 %vm344_vm2, %v1239_v15  ;;  %3437 = vmatprep.mubr.msk.f32.mxu0 %vm3667_vm1, %v3666_v10 }
 0x37f   : > { %3445 = vmatprep.subr.mxu0 %v3666_v10  ;;  %3442 = vmatprep.mubr.msk.f32.mxu1 %vm3667_vm1, %v3666_v10 }
 0x381   : > { %3438 = vmatmul.mubr.msk.f32.vlgmr.msra.gmra.mrb[14].mxu0 %vm344_vm2, %v1237_v20 }
 0x382   : > { %3447 = vmatprep.mubr.msk.f32.mxu0 %vm3667_vm1, %v3666_v10 }
 0x440   : > { %v766_v21 = vpop.f32.mrb[4].mxu1 }
 0x441   : > { %998 = vst.msk [vmem:[#allocation2] sm:$0xff] %vm344_vm2, %v766_v21  ;;  %v3404_v22 = vpop.f32.mrb[5].mxu1 }
 0x444   : > { %v842_v23 = vpop.f32.mrb[8].mxu0 }
 0x445   : > { %999 = vst.msk [vmem:[#allocation2 + $0x8] sm:$0xff] %vm344_vm2, %v842_v23  ;;  %v3409_v24 = vpop.f32.mrb[9].mxu0 }
 0x448   : > { %v918_v25 = vpop.f32.mrb[6].mxu1 }
 0x449   : > { %1000 = vst.msk [vmem:[#allocation2 + $0x10] sm:$0xff] %vm344_vm2, %v918_v25  ;;  %v3414_v26 = vpop.f32.mrb[7].mxu1 }
 0x44c   : > { %v994_v27 = vpop.f32.mrb[10].mxu0  ;;  %v1076_v28 = vpop.f32.mrb[8].mxu1 }
 0x44d   : > { %1001 = vst.msk [vmem:[#allocation2 + $0x18] sm:$0xff] %vm344_vm2, %v994_v27  ;;  %v3419_v29 = vpop.f32.mrb[11].mxu0  ;;  %v3424_v30 = vpop.f32.mrb[9].mxu1  ;;  %v1314_v31 = vsel %vm344_vm2, %v1076_v28, -inf }
 0x44e   : > { %1315 = vmax.xlane.f32.xlu0 %v1314_v31 }
 0x450   : > { %v1154_v32 = vpop.f32.mrb[12].mxu0  ;;  %v1232_v33 = vpop.f32.mrb[10].mxu1 }
 0x451   : > { %v3429_v34 = vpop.f32.mrb[13].mxu0  ;;  %v3434_v35 = vpop.f32.mrb[11].mxu1  ;;  %v1317_v36 = vsel %vm344_vm2, %v1154_v32, -inf  ;;  %v1320_v37 = vsel %vm344_vm2, %v1232_v33, -inf }
 0x452   : > { %1318 = vmax.xlane.f32.xlu1 %v1317_v36  ;;  %1321 = vmax.xlane.f32.xlu0 %v1320_v37 }
 0x454   : > { %v1310_v38 = vpop.f32.mrb[14].mxu0 }
 0x455   : > { %v3439_v39 = vpop.f32.mrb[15].mxu0  ;;  %v1323_v40 = vsel %vm344_vm2, %v1310_v38, -inf }
 0x456   : > { %1324 = vmax.xlane.f32.xlu0 %v1323_v40 }
 0x463   : > { %1358 = vrot.lane.b32.xlu1 %v3753_v14, %s3672_s14 }
 0x467   : > { %1510 = vrot.lane.b32.xlu1 %v3758_v18, %s3672_s14 }
 0x46b   : > { %1586 = vrot.lane.b32.xlu1 %v3760_v19, %s3672_s14 }
 0x46c   : > { %1434 = vrot.lane.b32.xlu0 %v3756_v17, %s3672_s14  ;;  %s226_s14 = scalar_lea.vmem %s4065_s5, %s3223_s29 }
 0x46f   : > { %1763 = vrot.lane.b32.xlu1 %v3756_v17, %s3673_s15 }
 0x470   : > { %1685 = vrot.lane.b32.xlu0 %v3753_v14, %s3673_s15 }
 0x4db   : > { %v1316_v41 = vpop.xlane.xlu0 %1315 }
 0x4dc   : > { %v1326_v42 = vsub.f32 %v1076_v28, %v1316_v41 }
 0x4de   : > { %v1330_v43 = vmul.f32 1.442695, %v1326_v42 }
 0x4df   : > { %v1319_v44 = vpop.xlane.xlu1 %1318  ;;  %v1322_v45 = vpop.xlane.xlu0 %1321 }
 0x4e0   : > { %3610 = vpow2.f32 %v1330_v43  ;;  %v1327_v46 = vsub.f32 %v1154_v32, %v1319_v44  ;;  %v1328_v59 = vsub.f32 %v1232_v33, %v1322_v45 }
 0x4e2   : > { %v1332_v47 = vmul.f32 1.442695, %v1327_v46  ;;  %v1334_v60 = vmul.f32 1.442695, %v1328_v59 }
 0x4e3   : > { %v1359_v48 = vpop.permute.xlu1 %1358  ;;  %v1325_v49 = vpop.xlane.xlu0 %1324 }
 0x4e4   : > { %3612 = vpow2.f32 %v1332_v47  ;;  %v1329_v50 = vsub.f32 %v1310_v38, %v1325_v49  ;;  %3441 = vmatpush3.msra.mxu1 %v1359_v48 }
 0x4e5   : > { %3450 = vmatprep.subr.mxu1 %v3666_v10 }
 0x4e6   : > { %v1336_v51 = vmul.f32 1.442695, %v1329_v50 }
 0x4e7   : > { %v1435_v52 = vpop.permute.xlu0 %1434  ;;  %v1511_v63 = vpop.permute.xlu1 %1510 }
 0x4e8   : > { %3614 = vpow2.f32 %v1336_v51  ;;  %3446 = vmatpush3.msra.mxu0 %v1435_v52 }
 0x4e9   : > { %3455 = vmatprep.subr.mxu0 %v3666_v10  ;;  %3616 = vpow2.f32 %v1334_v60 }
 0x4ea   : > { %v3611_v53 = vpop.eup %3610 }
 0x4eb   : > { %v1338_v54 = vsel %vm344_vm2, %v3611_v53, 0.0  ;;  %v1587_v0 = vpop.permute.xlu1 %1586  ;;  %v1686_v2 = vpop.permute.xlu0 %1685 }
 0x4ec   : > { %1339 = vadd.xlane.f32.xlu1 %v1338_v54 }
 0x4ee   : > { %v3613_v55 = vpop.eup %3612 }
 0x4ef   : > { %v1341_v56 = vsel %vm344_vm2, %v3613_v55, 0.0  ;;  %v1764_v1 = vpop.permute.xlu1 %1763 }
 0x4f0   : > { %1342 = vadd.xlane.f32.xlu0 %v1341_v56 }
 0x4f2   : > { %v3615_v57 = vpop.eup %3614 }
 0x4f3   : > { %v1347_v58 = vsel %vm344_vm2, %v3615_v57, 0.0  ;;  %v3617_v61 = vpop.eup %3616 }
 0x4f4   : > { %1348 = vadd.xlane.f32.xlu0 %v1347_v58  ;;  %v1344_v62 = vsel %vm344_vm2, %v3617_v61, 0.0 }
 0x4fd   : > { %1761 = vrot.lane.b32.xlu1 %v3756_v17, %s3674_s16 }
 0x50a   : > { %1683 = vrot.lane.b32.xlu0 %v3753_v14, %s3674_s16 }
 0x50e   : > { %1841 = vrot.lane.b32.xlu0 %v3758_v18, %s3673_s15 }
 0x512   : > { %1839 = vrot.lane.b32.xlu0 %v3758_v18, %s3674_s16 }
 0x516   : > { %2115 = vrot.lane.b32.xlu0 %v3756_v17, %s3675_s17 }
 0x521   : > { %1345 = vadd.xlane.f32.xlu1 %v1344_v62 }
 0x532   : > { %1919 = vrot.lane.b32.xlu1 %v3760_v19, %s3673_s15 }
 0x536   : > { %1917 = vrot.lane.b32.xlu1 %v3760_v19, %s3674_s16 }
 0x53a   : > { %2039 = vrot.lane.b32.xlu1 %v3753_v14, %s3675_s17 }
 0x53e   : > { %2191 = vrot.lane.b32.xlu1 %v3758_v18, %s3675_s17 }
 0x542   : > { %2267 = vrot.lane.b32.xlu1 %v3760_v19, %s3675_s17 }
 0x579   : > { %v1340_v3 = vpop.xlane.xlu1 %1339 }
 0x57a   : > { %3618 = vrcp.f32 %v1340_v3 }
 0x57d   : > { %v1343_v4 = vpop.xlane.xlu0 %1342  ;;  %v1762_v13 = vpop.permute.xlu1 %1761 }
 0x57e   : > { %3620 = vrcp.f32 %v1343_v4 }
 0x581   : > { %v1349_v5 = vpop.xlane.xlu0 %1348 }
 0x582   : > { %3622 = vrcp.f32 %v1349_v5 }
 0x584   : > { %v3619_v6 = vpop.eup %3618 }
 0x585   : > { %v1354_v7 = vmul.f32 %v3619_v6, %v3611_v53  ;;  %v1684_v15 = vpop.permute.xlu0 %1683 }
 0x587   : > { %3443 = vmatmul.mubr.msk.f32.vlgmr.msra.gmra.mrb[12].mxu1 %vm344_vm2, %v1354_v7 }
 0x588   : > { %v3621_v8 = vpop.eup %3620  ;;  %3451 = vmatpush3.msra.mxu1 %v1511_v63  ;;  %3452 = vmatprep.mubr.msk.f32.mxu1 %vm3667_vm1, %v3666_v10 }
 0x589   : > { %v1355_v9 = vmul.f32 %v3621_v8, %v3613_v55  ;;  %3460 = vmatprep.subr.mxu1 %v3666_v10  ;;  %v1842_v16 = vpop.permute.xlu0 %1841 }
 0x58b   : > { %3448 = vmatmul.mubr.msk.f32.vlgmr.msra.gmra.mrb[16].mxu0 %vm344_vm2, %v1355_v9 }
 0x58c   : > { %v3623_v11 = vpop.eup %3622  ;;  %3456 = vmatpush3.msra.mxu0 %v1587_v0  ;;  %3457 = vmatprep.mubr.msk.f32.mxu0 %vm3667_vm1, %v3666_v10 }
 0x58d   : > { %v1357_v12 = vmul.f32 %v3623_v11, %v3615_v57  ;;  %3465 = vmatprep.subr.mxu0 %v3666_v10  ;;  %v1840_v21 = vpop.permute.xlu0 %1839 }
 0x58f   : > { %3458 = vmatmul.mubr.msk.f32.vlgmr.msra.gmra.mrb[18].mxu0 %vm344_vm2, %v1357_v12 }
 0x590   : > { %3467 = vmatprep.mubr.msk.f32.mxu0 %vm3667_vm1, %v3666_v10 }
 0x591   : > { %v2116_v24 = vpop.permute.xlu0 %2115 }
 0x593   : > { %3466 = vmatpush3.xpose.msk.msra.mxu0 %vm344_vm2, %v1764_v1 }
 0x594   : > { %3475 = vmatprep.subr.mxu0 %v3666_v10 }
 0x596   : > { %3468 = vmatmul.mubr.msk.f32.vlgmr.msra.gmra.mrb[20].mxu0 %vm344_vm2, %v1762_v13 }
 0x597   : > { %3477 = vmatprep.mubr.msk.f32.mxu0 %vm3667_vm1, %v3666_v10 }
 0x5ae   : > { %v1346_v20 = vpop.xlane.xlu1 %1345 }
 0x5af   : > { %3624 = vrcp.f32 %v1346_v20 }
 0x5b2   : > { %v1920_v22 = vpop.permute.xlu1 %1919 }
 0x5b3   : > { %3476 = vmatpush3.xpose.msk.msra.mxu0 %vm344_vm2, %v1920_v22 }
 0x5b4   : > { %3485 = vmatprep.subr.mxu0 %v3666_v10 }
 0x5b6   : > { %v1918_v23 = vpop.permute.xlu1 %1917 }
 0x5b7   : > { %3478 = vmatmul.mubr.msk.f32.vlgmr.msra.gmra.mrb[22].mxu0 %vm344_vm2, %v1918_v23 }
 0x5b8   : > { %3486 = vmatpush3.msra.mxu0 %v2116_v24  ;;  %3487 = vmatprep.mubr.msk.f32.mxu0 %vm3667_vm1, %v3666_v10 }
 0x5b9   : > { %v3625_v25 = vpop.eup %3624  ;;  %3495 = vmatprep.subr.mxu0 %v3666_v10 }
 0x5ba   : > { %v1356_v26 = vmul.f32 %v3625_v25, %v3617_v61  ;;  %v2040_v27 = vpop.permute.xlu1 %2039 }
 0x5bc   : > { %3453 = vmatmul.mubr.msk.f32.vlgmr.msra.gmra.mrb[14].mxu1 %vm344_vm2, %v1356_v26 }
 0x5bd   : > { %3461 = vmatpush3.xpose.msk.msra.mxu1 %vm344_vm2, %v1686_v2  ;;  %3462 = vmatprep.mubr.msk.f32.mxu1 %vm3667_vm1, %v3666_v10 }
 0x5be   : > { %3470 = vmatprep.subr.mxu1 %v3666_v10  ;;  %v2192_v48 = vpop.permute.xlu1 %2191 }
 0x5c0   : > { %3463 = vmatmul.mubr.msk.f32.vlgmr.msra.gmra.mrb[16].mxu1 %vm344_vm2, %v1684_v15 }
 0x5c1   : > { %3471 = vmatpush3.xpose.msk.msra.mxu1 %vm344_vm2, %v1842_v16  ;;  %3472 = vmatprep.mubr.msk.f32.mxu1 %vm3667_vm1, %v3666_v10 }
 0x5c2   : > { %3480 = vmatprep.subr.mxu1 %v3666_v10  ;;  %v2268_v49 = vpop.permute.xlu1 %2267 }
 0x5c4   : > { %3473 = vmatmul.mubr.msk.f32.vlgmr.msra.gmra.mrb[18].mxu1 %vm344_vm2, %v1840_v21 }
 0x5c5   : > { %3481 = vmatpush3.msra.mxu1 %v2040_v27  ;;  %3482 = vmatprep.mubr.msk.f32.mxu1 %vm3667_vm1, %v3666_v10 }
 0x5c6   : > { %3490 = vmatprep.subr.mxu1 %v3666_v10 }
 0x65a   : > { %v3919_v28 = vpop.f32.mrb[12].mxu1 }
 0x65b   : > { %v3444_v29 = vpop.f32.mrb[13].mxu1 }
 0x65e   : > { %v3921_v30 = vpop.f32.mrb[16].mxu0 }
 0x65f   : > { %v3449_v31 = vpop.f32.mrb[17].mxu0 }
 0x662   : > { %v3923_v32 = vpop.f32.mrb[18].mxu0 }
 0x663   : > { %v3459_v33 = vpop.f32.mrb[19].mxu0 }
 0x669   : > { %v1835_v34 = vpop.f32.mrb[20].mxu0 }
 0x66a   : > { %v3469_v35 = vpop.f32.mrb[21].mxu0  ;;  %v1998_v36 = vsel %vm344_vm2, %v1835_v34, -inf }
 0x66b   : > { %1999 = vmax.xlane.f32.xlu1 %v1998_v36 }
 0x67c   : > { %2444 = vrot.lane.b32.xlu1 %v3756_v17, %s3676_s19 }
 0x680   : > { %2442 = vrot.lane.b32.xlu1 %v3756_v17, %s3677_s20 }
 0x68a   : > { %v1991_v37 = vpop.f32.mrb[22].mxu0 }
 0x68b   : > { %v3479_v38 = vpop.f32.mrb[23].mxu0  ;;  %v2004_v46 = vsel %vm344_vm2, %v1991_v37, -inf }
 0x68f   : > { %v3930_v39 = vpop.f32.mrb[14].mxu1 }
 0x690   : > { %v3454_v40 = vpop.f32.mrb[15].mxu1 }
 0x693   : > { %v1757_v41 = vpop.f32.mrb[16].mxu1 }
 0x694   : > { %v3464_v42 = vpop.f32.mrb[17].mxu1  ;;  %v1995_v43 = vsel %vm344_vm2, %v1757_v41, -inf }
 0x695   : > { %1996 = vmax.xlane.f32.xlu0 %v1995_v43 }
 0x697   : > { %v1913_v44 = vpop.f32.mrb[18].mxu1 }
 0x698   : > { %v3474_v45 = vpop.f32.mrb[19].mxu1  ;;  %v2001_v47 = vsel %vm344_vm2, %v1913_v44, -inf }
 0x699   : > { %2005 = vmax.xlane.f32.xlu0 %v2004_v46 }
 0x69d   : > { %2002 = vmax.xlane.f32.xlu0 %v2001_v47 }
 0x6b3   : > { %2366 = vrot.lane.b32.xlu0 %v3753_v14, %s3676_s19 }
 0x6f8   : > { %v2000_v50 = vpop.xlane.xlu1 %1999 }
 0x6f9   : > { %v2008_v51 = vsub.f32 %v1835_v34, %v2000_v50 }
 0x6fb   : > { %v2013_v52 = vmul.f32 1.442695, %v2008_v51 }
 0x6fc   : > { %v2445_v11 = vpop.permute.xlu1 %2444 }
 0x6fd   : > { %3626 = vpow2.f32 %v2013_v52 }
 0x700   : > { %v2443_v12 = vpop.permute.xlu1 %2442 }
 0x707   : > { %v3627_v53 = vpop.eup %3626 }
 0x708   : > { %v2022_v54 = vsel %vm344_vm2, %v3627_v53, 0.0 }
 0x709   : > { %2023 = vadd.xlane.f32.xlu0 %v2022_v54 }
 0x71f   : > { %2364 = vrot.lane.b32.xlu0 %v3753_v14, %s3677_s20 }
 0x722   : > { %v1997_v55 = vpop.xlane.xlu0 %1996 }
 0x723   : > { %v2007_v56 = vsub.f32 %v1757_v41, %v1997_v55 }
 0x725   : > { %v2011_v57 = vmul.f32 1.442695, %v2007_v56 }
 0x726   : > { %v2006_v58 = vpop.xlane.xlu0 %2005 }
 0x727   : > { %3628 = vpow2.f32 %v2011_v57  ;;  %v2010_v59 = vsub.f32 %v1991_v37, %v2006_v58 }
 0x729   : > { %v2017_v60 = vmul.f32 1.442695, %v2010_v59 }
 0x72a   : > { %v2003_v1 = vpop.xlane.xlu0 %2002 }
 0x72b   : > { %3630 = vpow2.f32 %v2017_v60  ;;  %v2009_v2 = vsub.f32 %v1913_v44, %v2003_v1 }
 0x72d   : > { %v2015_v3 = vmul.f32 1.442695, %v2009_v2 }
 0x72e   : > { %v2367_v6 = vpop.permute.xlu0 %2366 }
 0x72f   : > { %3632 = vpow2.f32 %v2015_v3 }
 0x731   : > { %v3629_v61 = vpop.eup %3628 }
 0x732   : > { %v2019_v62 = vsel %vm344_vm2, %v3629_v61, 0.0 }
 0x733   : > { %2020 = vadd.xlane.f32.xlu1 %v2019_v62 }
 0x735   : > { %v3631_v63 = vpop.eup %3630 }
 0x736   : > { %v2028_v0 = vsel %vm344_vm2, %v3631_v63, 0.0 }
 0x739   : > { %v3633_v4 = vpop.eup %3632 }
 0x73a   : > { %v2025_v5 = vsel %vm344_vm2, %v3633_v4, 0.0 }
 0x73e   : > { %2029 = vadd.xlane.f32.xlu0 %v2028_v0 }
 0x744   : > { %2600 = vrot.lane.b32.xlu1 %v3760_v19, %s3676_s19 }
 0x754   : > { %2522 = vrot.lane.b32.xlu0 %v3758_v18, %s3676_s19 }
 0x758   : > { %2520 = vrot.lane.b32.xlu0 %v3758_v18, %s3677_s20 }
 0x768   : > { %2026 = vadd.xlane.f32.xlu1 %v2025_v5 }
 0x779   : > { %2598 = vrot.lane.b32.xlu1 %v3760_v19, %s3677_s20 }
 0x796   : > { %v2024_v7 = vpop.xlane.xlu0 %2023 }
 0x797   : > { %3634 = vrcp.f32 %v2024_v7 }
 0x79a   : > { %v2365_v15 = vpop.permute.xlu0 %2364 }
 0x7a1   : > { %v3635_v8 = vpop.eup %3634 }
 0x7a2   : > { %v2036_v9 = vmul.f32 %v3635_v8, %v3627_v53 }
 0x7a4   : > { %3488 = vmatmul.mubr.msk.f32.vlgmr.msra.gmra.mrb[24].mxu0 %vm344_vm2, %v2036_v9 }
 0x7a5   : > { %3496 = vmatpush3.msra.mxu0 %v2268_v49  ;;  %3497 = vmatprep.mubr.msk.f32.mxu0 %vm3667_vm1, %v3666_v10 }
 0x7a6   : > { %3505 = vmatprep.subr.mxu0 %v3666_v10 }
 0x7c0   : > { %v2021_v13 = vpop.xlane.xlu1 %2020 }
 0x7c1   : > { %3636 = vrcp.f32 %v2021_v13 }
 0x7c4   : > { %v2601_v24 = vpop.permute.xlu1 %2600 }
 0x7cb   : > { %v3637_v16 = vpop.eup %3636  ;;  %v2030_v20 = vpop.xlane.xlu0 %2029 }
 0x7cc   : > { %v2035_v21 = vmul.f32 %v3637_v16, %v3629_v61  ;;  %3638 = vrcp.f32 %v2030_v20 }
 0x7ce   : > { %3483 = vmatmul.mubr.msk.f32.vlgmr.msra.gmra.mrb[20].mxu1 %vm344_vm2, %v2035_v21 }
 0x7cf   : > { %3491 = vmatpush3.msra.mxu1 %v2192_v48  ;;  %3492 = vmatprep.mubr.msk.f32.mxu1 %vm3667_vm1, %v3666_v10  ;;  %v2523_v31 = vpop.permute.xlu0 %2522 }
 0x7d0   : > { %3500 = vmatprep.subr.mxu1 %v3666_v10 }
 0x7d3   : > { %v2521_v33 = vpop.permute.xlu0 %2520 }
 0x7d6   : > { %v3639_v22 = vpop.eup %3638 }
 0x7d7   : > { %v2038_v23 = vmul.f32 %v3639_v22, %v3631_v63 }
 0x7d9   : > { %3498 = vmatmul.mubr.msk.f32.vlgmr.msra.gmra.mrb[26].mxu0 %vm344_vm2, %v2038_v23 }
 0x7da   : > { %3506 = vmatpush3.xpose.msk.msra.mxu0 %vm344_vm2, %v2445_v11  ;;  %3507 = vmatprep.mubr.msk.f32.mxu0 %vm3667_vm1, %v3666_v10 }
 0x7db   : > { %3515 = vmatprep.subr.mxu0 %v3666_v10 }
 0x7dd   : > { %3508 = vmatmul.mubr.msk.f32.vlgmr.msra.gmra.mrb[28].mxu0 %vm344_vm2, %v2443_v12 }
 0x7de   : > { %3516 = vmatpush3.xpose.msk.msra.mxu0 %vm344_vm2, %v2601_v24  ;;  %3517 = vmatprep.mubr.msk.f32.mxu0 %vm3667_vm1, %v3666_v10 }
 0x7df   : > { %3525 = vmatprep.subr.mxu0 %v3666_v10 }
 0x7f5   : > { %v2027_v25 = vpop.xlane.xlu1 %2026 }
 0x7f6   : > { %3640 = vrcp.f32 %v2027_v25 }
 0x7f9   : > { %v2599_v26 = vpop.permute.xlu1 %2598 }
 0x7fa   : > { %3518 = vmatmul.mubr.msk.f32.vlgmr.msra.gmra.mrb[30].mxu0 %vm344_vm2, %v2599_v26 }
 0x7fb   : > { %3527 = vmatprep.mubr.msk.f32.mxu0 %vm3667_vm1, %v3666_v10 }
 0x800   : > { %v3641_v27 = vpop.eup %3640 }
 0x801   : > { %v2037_v29 = vmul.f32 %v3641_v27, %v3633_v4 }
 0x803   : > { %3493 = vmatmul.mubr.msk.f32.vlgmr.msra.gmra.mrb[22].mxu1 %vm344_vm2, %v2037_v29 }
 0x804   : > { %3501 = vmatpush3.xpose.msk.msra.mxu1 %vm344_vm2, %v2367_v6  ;;  %3502 = vmatprep.mubr.msk.f32.mxu1 %vm3667_vm1, %v3666_v10 }
 0x805   : > { %3510 = vmatprep.subr.mxu1 %v3666_v10 }
 0x807   : > { %3503 = vmatmul.mubr.msk.f32.vlgmr.msra.gmra.mrb[24].mxu1 %vm344_vm2, %v2365_v15 }
 0x808   : > { %3511 = vmatpush3.xpose.msk.msra.mxu1 %vm344_vm2, %v2523_v31  ;;  %3512 = vmatprep.mubr.msk.f32.mxu1 %vm3667_vm1, %v3666_v10 }
 0x809   : > { %3520 = vmatprep.subr.mxu1 %v3666_v10 }
 0x80b   : > { %3513 = vmatmul.mubr.msk.f32.vlgmr.msra.gmra.mrb[26].mxu1 %vm344_vm2, %v2521_v33 }
 0x80c   : > { %3522 = vmatprep.mubr.msk.f32.mxu1 %vm3667_vm1, %v3666_v10 }
 0x877   : > { %v3985_v34 = vpop.f32.mrb[24].mxu0 }
 0x878   : > { %v3489_v35 = vpop.f32.mrb[25].mxu0 }
 0x879   : > { %v3050_v35 = vld [vmem:[%s4063_s3 + $0x8] sm:$0xff] }
 0x8a1   : > { %v2111_v36 = vpop.f32.mrb[20].mxu1 }
 0x8a2   : > { %v3484_v37 = vpop.f32.mrb[21].mxu1 }
 0x8ac   : > { %v3987_v38 = vpop.f32.mrb[26].mxu0 }
 0x8ad   : > { %v3499_v40 = vpop.f32.mrb[27].mxu0 }
 0x8b0   : > { %v2516_v41 = vpop.f32.mrb[28].mxu0 }
 0x8b1   : > { %v3509_v42 = vpop.f32.mrb[29].mxu0  ;;  %v2679_v43 = vsel %vm344_vm2, %v2516_v41, -inf }
 0x8b2   : > { %2680 = vmax.xlane.f32.xlu1 %v2679_v43 }
 0x8c3   : > { %2720 = vrot.lane.b32.xlu1 %v3753_v14, %s3678_s21 }
 0x8cd   : > { %v2672_v44 = vpop.f32.mrb[30].mxu0 }
 0x8ce   : > { %v3519_v45 = vpop.f32.mrb[31].mxu0  ;;  %v2685_v54 = vsel %vm344_vm2, %v2672_v44, -inf }
 0x8d6   : > { %v2263_v46 = vpop.f32.mrb[22].mxu1 }
 0x8d7   : > { %v3494_v47 = vpop.f32.mrb[23].mxu1 }
 0x8da   : > { %v2438_v48 = vpop.f32.mrb[24].mxu1 }
 0x8db   : > { %v3504_v49 = vpop.f32.mrb[25].mxu1  ;;  %v2676_v50 = vsel %vm344_vm2, %v2438_v48, -inf }
 0x8dc   : > { %2677 = vmax.xlane.f32.xlu0 %v2676_v50 }
 0x8de   : > { %v2594_v51 = vpop.f32.mrb[26].mxu1 }
 0x8df   : > { %v3514_v52 = vpop.f32.mrb[27].mxu1  ;;  %v2682_v53 = vsel %vm344_vm2, %v2594_v51, -inf }
 0x8e0   : > { %2683 = vmax.xlane.f32.xlu0 %v2682_v53 }
 0x8e4   : > { %2686 = vmax.xlane.f32.xlu0 %v2685_v54 }
 0x93f   : > { %v2681_v55 = vpop.xlane.xlu1 %2680 }
 0x940   : > { %v2689_v56 = vsub.f32 %v2516_v41, %v2681_v55 }
 0x942   : > { %v2694_v14 = vmul.f32 1.442695, %v2689_v56 }
 0x943   : > { %v2721_v57 = vpop.permute.xlu1 %2720 }
 0x944   : > { %3642 = vpow2.f32 %v2694_v14  ;;  %3521 = vmatpush3.msra.mxu1 %v2721_v57  ;;  %v3279_v14 = vld [vmem:[%s4064_s4] ss:$0 sm:$0xff] }
 0x945   : > { %3530 = vmatprep.subr.mxu1 %v3666_v10 }
 0x94e   : > { %v3643_v58 = vpop.eup %3642 }
 0x94f   : > { %v2703_v59 = vsel %vm344_vm2, %v3643_v58, 0.0 }
 0x950   : > { %2704 = vadd.xlane.f32.xlu0 %v2703_v59 }
 0x969   : > { %v2678_v60 = vpop.xlane.xlu0 %2677 }
 0x96a   : > { %v2688_v61 = vsub.f32 %v2438_v48, %v2678_v60 }
 0x96c   : > { %v2692_v62 = vmul.f32 1.442695, %v2688_v61 }
 0x96d   : > { %v2684_v63 = vpop.xlane.xlu0 %2683 }
 0x96e   : > { %3644 = vpow2.f32 %v2692_v62  ;;  %v2690_v7 = vsub.f32 %v2594_v51, %v2684_v63 }
 0x970   : > { %v2696_v8 = vmul.f32 1.442695, %v2690_v7 }
 0x971   : > { %v2687_v0 = vpop.xlane.xlu0 %2686 }
 0x972   : > { %v2691_v1 = vsub.f32 %v2672_v44, %v2687_v0 }
 0x974   : > { %v2698_v2 = vmul.f32 1.442695, %v2691_v1 }
 0x976   : > { %3646 = vpow2.f32 %v2698_v2 }
 0x977   : > { %3648 = vpow2.f32 %v2696_v8 }
 0x978   : > { %v3645_v3 = vpop.eup %3644 }
 0x979   : > { %v2700_v4 = vsel %vm344_vm2, %v3645_v3, 0.0 }
 0x97a   : > { %2701 = vadd.xlane.f32.xlu1 %v2700_v4 }
 0x980   : > { %v3647_v5 = vpop.eup %3646 }
 0x981   : > { %v2709_v6 = vsel %vm344_vm2, %v3647_v5, 0.0  ;;  %v3649_v9 = vpop.eup %3648 }
 0x982   : > { %2710 = vadd.xlane.f32.xlu0 %v2709_v6  ;;  %v2706_v11 = vsel %vm344_vm2, %v3649_v9, 0.0 }
 0x98b   : > { %2872 = vrot.lane.b32.xlu1 %v3758_v18, %s3678_s21 }
 0x998   : > { %2796 = vrot.lane.b32.xlu0 %v3756_v17, %s3678_s21 }
 0x99c   : > { %1666 = vrot.lane.b32.xlu0 %v3919_v28, %s3679_s22 }
 0x9a0   : > { %2347 = vrot.lane.b32.xlu0 %v2111_v36, %s3680_s23  ;;  %v3051_v36 = vld [vmem:[%s4063_s3 + $0x10] sm:$0xff] }
 0x9a4   : > { %1670 = vrot.lane.b32.xlu0 %v3930_v39, %s3679_s22 }
 0x9a8   : > { %2351 = vrot.lane.b32.xlu0 %v2263_v46, %s3680_s23 }
 0x9af   : > { %2707 = vadd.xlane.f32.xlu1 %v2706_v11 }
 0x9c0   : > { %2948 = vrot.lane.b32.xlu1 %v3760_v19, %s3678_s21 }
 0x9c4   : > { %1668 = vrot.lane.b32.xlu1 %v3921_v30, %s3679_s22 }
 0x9c8   : > { %2349 = vrot.lane.b32.xlu1 %v3985_v34, %s3680_s23  ;;  %v3049_v34 = vld [vmem:[%s4063_s3] sm:$0xff] }
 0x9c9   : > { %v3562_v37 = vpack.c.bf16 %v3050_v35, %v3049_v34 }
 0x9cc   : > { %1672 = vrot.lane.b32.xlu1 %v3923_v32, %s3679_s22 }
 0x9d0   : > { %2353 = vrot.lane.b32.xlu1 %v3987_v38, %s3680_s23  ;;  %v3052_v38 = vld [vmem:[%s4063_s3 + $0x18] sm:$0xff] }
 0x9d1   : > { %v3566_v40 = vpack.c.bf16 %v3052_v38, %v3051_v36 }
 0x9dd   : > { %v2705_v17 = vpop.xlane.xlu0 %2704 }
 0x9de   : > { %3650 = vrcp.f32 %v2705_v17 }
 0x9e8   : > { %v3651_v39 = vpop.eup %3650 }
 0x9e9   : > { %v2717_v13 = vmul.f32 %v3651_v39, %v3643_v58 }
 0xa07   : > { %v2702_v18 = vpop.xlane.xlu1 %2701 }
 0xa08   : > { %3652 = vrcp.f32 %v2702_v18 }
 0xa0b   : > { %v2873_v19 = vpop.permute.xlu1 %2872 }
 0xa0f   : > { %v2711_v28 = vpop.xlane.xlu0 %2710 }
 0xa10   : > { %3654 = vrcp.f32 %v2711_v28 }
 0xa12   : > { %v3653_v12 = vpop.eup %3652 }
 0xa13   : > { %v2716_v15 = vmul.f32 %v3653_v12, %v3645_v3  ;;  %v2797_v16 = vpop.permute.xlu0 %2796 }
 0xa14   : > { %3526 = vmatpush3.msra.mxu0 %v2797_v16 }
 0xa15   : > { %3523 = vmatmul.mubr.msk.f32.vlgmr.msra.gmra.mrb[28].mxu1 %vm344_vm2, %v2716_v15  ;;  %3528 = vmatmul.mubr.msk.f32.vlgmr.msra.gmra.mrb[32].mxu0 %vm344_vm2, %v2717_v13 }
 0xa16   : > { %3531 = vmatpush3.msra.mxu1 %v2873_v19  ;;  %3535 = vmatprep.subr.mxu0 %v3666_v10 }
 0xa17   : > { %v1667_v30 = vpop.permute.xlu0 %1666  ;;  %3537 = vmatprep.mubr.msk.f32.mxu0 %vm3667_vm1, %v3666_v10  ;;  %3532 = vmatprep.mubr.msk.f32.mxu1 %vm3667_vm1, %v3666_v10 }
 0xa18   : > { %1679 = vst.msk [vmem:[#allocation2] sm:$0xff] %vm1678_vm3, %v1667_v30  ;;  %3563 = vmatprep.subr.bf16.mxu1 %v3562_v37 }
 0xa1a   : > { %v3655_v23 = vpop.eup %3654 }
 0xa1b   : > { %v2348_v32 = vpop.permute.xlu0 %2347  ;;  %v2719_v24 = vmul.f32 %v3655_v23, %v3647_v5 }
 0xa1c   : > { %2360 = vst.msk [vmem:[#allocation2] sm:$0xff] %vm2359_vm4, %v2348_v32 }
 0xa1f   : > { %v1671_v20 = vpop.permute.xlu0 %1670 }
 0xa20   : > { %1681 = vst.msk [vmem:[#allocation2 + $0x10] sm:$0xff] %vm1678_vm3, %v1671_v20 }
 0xa23   : > { %v2352_v21 = vpop.permute.xlu0 %2351 }
 0xa24   : > { %2362 = vst.msk [vmem:[#allocation2 + $0x10] sm:$0xff] %vm2359_vm4, %v2352_v21 }
 0xa3c   : > { %v2708_v22 = vpop.xlane.xlu1 %2707 }
 0xa3d   : > { %3656 = vrcp.f32 %v2708_v22 }
 0xa40   : > { %v2949_v25 = vpop.permute.xlu1 %2948 }
 0xa41   : > { %3536 = vmatpush3.msra.mxu0 %v2949_v25 }
 0xa42   : > { %3538 = vmatmul.mubr.msk.f32.vlgmr.msra.gmra.mrb[34].mxu0 %vm344_vm2, %v2719_v24 }
 0xa44   : > { %v1669_v10 = vpop.permute.xlu1 %1668 }
 0xa45   : > { %1680 = vst.msk [vmem:[#allocation2 + $0x8] sm:$0xff] %vm1678_vm3, %v1669_v10 }
 0xa47   : > { %v3657_v26 = vpop.eup %3656 }
 0xa48   : > { %v2718_v27 = vmul.f32 %v3657_v26, %v3649_v9  ;;  %v2350_v29 = vpop.permute.xlu1 %2349 }
 0xa49   : > { %2361 = vst.msk [vmem:[#allocation2 + $0x8] sm:$0xff] %vm2359_vm4, %v2350_v29 }
 0xa4a   : > { %3533 = vmatmul.mubr.msk.f32.vlgmr.msra.gmra.mrb[30].mxu1 %vm344_vm2, %v2718_v27 }
 0xa4b   : > { %3565 = vmatpush3.bf16.msra.mxu1 %v3562_v37 }
 0xa4c   : > { %v1673_v31 = vpop.permute.xlu1 %1672  ;;  %3567 = vmatprep.subr.bf16.mxu1 %v3566_v40 }
 0xa4d   : > { %1682 = vst.msk [vmem:[#allocation2 + $0x18] sm:$0xff] %vm1678_vm3, %v1673_v31 }
 0xa4f   : > { %3569 = vmatpush3.bf16.msra.mxu1 %v3566_v40 }
 0xa50   : > { %v2354_v33 = vpop.permute.xlu1 %2353 }
 0xa51   : > { %2363 = vst.msk [vmem:[#allocation2 + $0x18] sm:$0xff] %vm2359_vm4, %v2354_v33 }
 0xae8   : > { %v2792_v41 = vpop.f32.mrb[28].mxu1  ;;  %v2868_v42 = vpop.f32.mrb[32].mxu0 }
 0xae9   : > { %v3524_v43 = vpop.f32.mrb[29].mxu1  ;;  %3028 = vrot.lane.b32.xlu0 %v2792_v41, %s3681_s9  ;;  %3030 = vrot.lane.b32.xlu1 %v2868_v42, %s3681_s9  ;;  %v3529_v44 = vpop.f32.mrb[33].mxu0 }
 0xb15   : > { %v3020_v45 = vpop.f32.mrb[34].mxu0 }
 0xb16   : > { %3034 = vrot.lane.b32.xlu1 %v3020_v45, %s3681_s9  ;;  %v3539_v46 = vpop.f32.mrb[35].mxu0 }
 0xb1d   : > { %v2944_v47 = vpop.f32.mrb[30].mxu1 }
 0xb1e   : > { %v3534_v48 = vpop.f32.mrb[31].mxu1  ;;  %3032 = vrot.lane.b32.xlu0 %v2944_v47, %s3681_s9 }
 0xb5b   : > { %v3031_v49 = vpop.permute.xlu1 %3030  ;;  %v3029_v50 = vpop.permute.xlu0 %3028 }
 0xb5c   : > { %3042 = vst.msk [vmem:[#allocation2 + $0x8] sm:$0xff] %vm3040_vm5, %v3031_v49  ;;  %3041 = vst.msk [vmem:[#allocation2] sm:$0xff] %vm3040_vm5, %v3029_v50 }
 0xb63   : > { %v3045_v51 = vld [vmem:[#allocation2] sm:$0xff]  ;;  %v3046_v52 = vld [vmem:[#allocation2 + $0x8] sm:$0xff] }
 0xb64   : > { %3548 = vmatprep.mubr.msk.f32.mxu1 %vm243_vm0, %v3045_v51 }
 0xb65   : > { %3549 = vmatmul.mubr.msk.f32.vlgmr.msra.gmra.mrb[32].mxu1 %vm243_vm0, %v3046_v52 }
 0xb88   : > { %v3035_v53 = vpop.permute.xlu1 %3034 }
 0xb89   : > { %3044 = vst.msk [vmem:[#allocation2 + $0x18] sm:$0xff] %vm3040_vm5, %v3035_v53 }
 0xb90   : > { %v3033_v54 = vpop.permute.xlu0 %3032  ;;  %v3048_v56 = vld [vmem:[#allocation2 + $0x18] sm:$0xff] }
 0xb91   : > { %3043 = vst.msk [vmem:[#allocation2 + $0x10] sm:$0xff] %vm3040_vm5, %v3033_v54 }
 0xb98   : > { %v3047_v55 = vld [vmem:[#allocation2 + $0x10] sm:$0xff] }
 0xb99   : > { %3551 = vmatprep.mubr.msk.f32.mxu1 %vm243_vm0, %v3047_v55 }
 0xb9a   : > { %3552 = vmatmul.mubr.msk.f32.gmra.mrb[34].mxu1 %vm243_vm0, %v3048_v56 }
 0xc38   : > { %v3550_v57 = vpop.f32.mrb[32].mxu1 }
 0xc39   : > { %v3138_v58 = vpop.f32.mrb[33].mxu1  ;;  %v3144_v60 = vadd.f32 %v3550_v57, %v3279_v14 }
 0xc3a   : > { %v3139_v59 = vadd.f32 %v3279_v14, %v3138_v58 }
 0xc3b   : > { %3158 = vst.msk [vmem:[%s226_s14 + $0x8] sm:$0xff] %vm243_vm0, %v3144_v60 }
 0xc3c   : > { %3157 = vst.msk [vmem:[%s226_s14] sm:$0xff] %vm243_vm0, %v3139_v59 }
 0xc6d   : > { %v3553_v61 = vpop.f32.mrb[34].mxu1 }
 0xc6e   : > { %v3148_v62 = vpop.f32.mrb[35].mxu1  ;;  %v3154_v0 = vadd.f32 %v3553_v61, %v3279_v14 }
 0xc6f   : > { %v3149_v63 = vadd.f32 %v3279_v14, %v3148_v62 }
 0xc70   : > { %3160 = vst.msk [vmem:[%s226_s14 + $0x18] sm:$0xff] %vm243_vm0, %v3154_v0 }
 0xc71   : > { %3159 = vst.msk [vmem:[%s226_s14 + $0x10] sm:$0xff] %vm243_vm0, %v3149_v63 }
 0xc72 PF: > { %s15_s18 = sadd.s32 1, %s3664_s18  }
 0xc73   : > { %p12_p4 = scmp.ge.s32.totalorder %s15_s18, 4  }
 0xc75   :  { %14 = sbr.rel (!%p12_p4) target bundleno = 1 (0x1), region = 70 }

</bundles_post_ra>
